<compile_context>
chip_gen: v7x
topology: tpu7x:2x2x1
jax: 0.10.0
libtpu: 0.0.40
codegen_flags: <defaults>
</compile_context>

<pallas_src>
import jax
import jax.numpy as jnp
from jax.experimental import pallas as pl
from jax.experimental.pallas import tpu as pltpu


def _gconv_kernel(w_ref, z_ref, b_ref, o_ref):
    """One (batch-tile, row-tile) grid step.

    w_ref : (TB, TI, J*N)   bf16  row-stacked operator rows for this tile
    z_ref : (TB, J*N, Cout) bf16  z = x @ Wfc, stacked over operators
    b_ref : (1, Cout)       f32   folded fc / BN bias
    o_ref : (TB, TI, Cout)  f32   output node features
    """
    acc = jnp.einsum('bik,bko->bio', w_ref[...], z_ref[...],
                     preferred_element_type=jnp.float32)
    o_ref[...] = acc + b_ref[...]


def gconv_forward(W, x, fc_w, fc_b, bn=None, eps=1e-5, bn_training=False,
                  row_tile=None, batch_tile=None, W_row_stacked=None):
    """Forward pass of Gconv.

    W    : (B, N, N, J) float32 graph operators (PyTorch module layout)
    x    : (B, N, F)    float32 node features
    fc_w : (Cout, J*F)  PyTorch-layout Linear weight
    fc_b : (Cout,)      Linear bias
    bn   : optional (gamma, beta, running_mean, running_var) inference BN,
           folded into fc_w / fc_b.
    W_row_stacked : optional (B, N, J*N) operator already row-stacked as
           [W_0 | W_1 | ...] along the last axis; skips the W relayout.
    Returns (W, out) with out: (B, N, Cout), mirroring the PyTorch module.
    """
    B, N, N2, J = W.shape
    assert N2 == N, W.shape
    F = x.shape[-1]
    Cout = fc_w.shape[0]
    assert fc_w.shape[1] == J * F, (fc_w.shape, J, F)

    if bn_training:
        # TODO(synk): training-mode BatchNorm1d (batch statistics over B*N
        # rows) is not implemented; only inference BN is folded.
        raise NotImplementedError("training-mode BatchNorm1d is not supported")

    w_eff, b_eff = fc_w, fc_b
    if bn is not None:
        gamma, beta, mean, var = bn
        scale = gamma / jnp.sqrt(var + eps)
        w_eff = fc_w * scale[:, None]
        b_eff = (fc_b - mean) * scale + beta

    # (Cout, J*F) -> (J, F, Cout): matches gmul's [j=0 feats | j=1 feats | ...]
    # feature ordering of the concat-then-Linear.
    wfc = jnp.transpose(w_eff.reshape(Cout, J, F), (1, 2, 0)).astype(jnp.float32)
    bias = b_eff.reshape(1, Cout).astype(jnp.float32)

    # Reassociated right factor: z[b, j*N + n, o] = sum_f x[b,n,f] * wfc[j,f,o].
    z = jnp.einsum('bnf,jfo->bjno', x.astype(jnp.float32), wfc,
                   precision=jax.lax.Precision.HIGHEST)
    z = z.reshape(B, J * N, Cout).astype(jnp.bfloat16)

    # Row-stacked operator: w_stk[b, r, j*N + n] = W[b, r, n, j].
    if W_row_stacked is not None:
        assert W_row_stacked.shape == (B, N, J * N), W_row_stacked.shape
        w_stk = W_row_stacked.astype(jnp.bfloat16)
    else:
        # Single fused bf16-downcast + transpose (half-size HBM write).
        w_stk = jnp.transpose(W.astype(jnp.bfloat16),
                              (0, 1, 3, 2)).reshape(B, N, J * N)

    if row_tile is None:
        # 128 fills the v5e MXU; on v6e/v7x pass row_tile=256 when N % 256 == 0.
        row_tile = 128 if (N > 128 and N % 128 == 0) else N
    assert N % row_tile == 0, (N, row_tile)

    if batch_tile is None:
        batch_tile = next(t for t in (16, 8, 4, 2, 1) if t <= B and B % t == 0)
    assert B % batch_tile == 0, (B, batch_tile)

    n_row_tiles = N // row_tile
    n_batch_tiles = B // batch_tile
    JN = J * N

    cost = pl.CostEstimate(
        flops=2 * B * N * JN * Cout,
        transcendentals=0,
        bytes_accessed=(w_stk.size * 2 + z.size * 2 + bias.size * 4
                        + B * N * Cout * 4),
    )

    out = pl.pallas_call(
        _gconv_kernel,
        out_shape=jax.ShapeDtypeStruct((B, N, Cout), jnp.float32),
        grid=(n_batch_tiles, n_row_tiles),
        in_specs=[
            pl.BlockSpec((batch_tile, row_tile, JN), lambda bt, i: (bt, i, 0)),
            pl.BlockSpec((batch_tile, JN, Cout), lambda bt, i: (bt, 0, 0)),
            pl.BlockSpec((1, Cout), lambda bt, i: (0, 0)),
        ],
        out_specs=pl.BlockSpec((batch_tile, row_tile, Cout),
                               lambda bt, i: (bt, i, 0)),
        compiler_params=pltpu.CompilerParams(
            dimension_semantics=("parallel", "parallel")),
        cost_estimate=cost,
    )(w_stk, z, bias)

    return W, out


def reference(W, x, fc_w, fc_b, bn=None, eps=1e-5):
    """Plain-JAX f32 reference mirroring the PyTorch gmul + Linear + BN(eval)."""
    B, N, _, J = W.shape
    hp = jax.lax.Precision.HIGHEST
    parts = [jnp.einsum('bij,bjf->bif', W[..., j], x, precision=hp)
             for j in range(J)]
    h = jnp.concatenate(parts, axis=-1)                        # (B, N, J*F)
    y = jnp.einsum('bnk,ok->bno', h, fc_w, precision=hp) + fc_b
    if bn is not None:
        gamma, beta, mean, var = bn
        y = (y - mean) / jnp.sqrt(var + eps) * gamma + beta
    return W, y


if __name__ == "__main__":
    B, N, F, Cout, J = 2, 8, 32, 16, 2
    key = jax.random.PRNGKey(0)
    kx, kw, kfc, kb, kg, kbe, km, kv = jax.random.split(key, 8)

    x = jax.random.normal(kx, (B, N, F), jnp.float32)

    # 'J2'-style operator stack: identity + row-stochastic attention weights.
    eye = jnp.broadcast_to(jnp.eye(N, dtype=jnp.float32)[None], (B, N, N))
    att = jax.nn.softmax(jax.random.normal(kw, (B, N, N), jnp.float32), axis=-1)
    W = jnp.stack([eye, att], axis=-1)                         # (B, N, N, J)
    # Producer-emitted row-stacked layout (skips the in-wrapper relayout).
    W_row_stacked = jnp.concatenate([eye, att], axis=-1)       # (B, N, J*N)

    fc_w = jax.random.normal(kfc, (Cout, J * F), jnp.float32) * 0.1
    fc_b = jax.random.normal(kb, (Cout,), jnp.float32) * 0.1
    gamma = 1.0 + 0.1 * jax.random.normal(kg, (Cout,), jnp.float32)
    beta = 0.1 * jax.random.normal(kbe, (Cout,), jnp.float32)
    mean = 0.1 * jax.random.normal(km, (Cout,), jnp.float32)
    var = 1.0 + 0.1 * jnp.abs(jax.random.normal(kv, (Cout,), jnp.float32))
    bn = (gamma, beta, mean, var)

    # Default path: module-layout W, fused transpose+bf16 downcast in wrapper.
    W_out, out = gconv_forward(W, x, fc_w, fc_b, bn=bn)
    out = jax.block_until_ready(out)

    # Fast path: producer supplies the row-stacked operator directly.
    _, out_fast = gconv_forward(W, x, fc_w, fc_b, bn=bn,
                                W_row_stacked=W_row_stacked)
    out_fast = jax.block_until_ready(out_fast)

    _, ref = reference(W, x, fc_w, fc_b, bn=bn)
    assert out.shape == (B, N, Cout), out.shape
    assert W_out.shape == W.shape, W_out.shape

    # bf16 MXU inputs with f32 accumulation -> slightly looser tolerance.
    if not jnp.allclose(out, ref, atol=3e-2, rtol=3e-2):
        err = float(jnp.max(jnp.abs(out - ref)))
        raise AssertionError(f"Pallas kernel output mismatch vs JAX reference "
                             f"(max abs err {err:.3e})")
    if not jnp.allclose(out_fast, out, atol=1e-5, rtol=1e-5):
        err = float(jnp.max(jnp.abs(out_fast - out)))
        raise AssertionError(f"row-stacked fast path mismatch "
                             f"(max abs err {err:.3e})")
    print("KERNEL_OK")
</pallas_src>

<mosaic_0001>
module attributes {stable_mosaic.version = 11 : i64} {
  func.func @_gconv_kernel(%arg0: i32, %arg1: i32, %arg2: memref<2x8x16xbf16, #tpu.memory_space<vmem>>, %arg3: memref<2x16x16xbf16, #tpu.memory_space<vmem>>, %arg4: memref<1x16xf32, #tpu.memory_space<vmem>>, %arg5: memref<2x8x16xf32, #tpu.memory_space<vmem>>) attributes {dimension_semantics = [#tpu.dimension_semantics<parallel>, #tpu.dimension_semantics<parallel>], iteration_bounds = array<i64: 1, 1>, scalar_prefetch = 0 : i64, scratch_operands = 0 : i64, tpu.core_type = #tpu.core_type<tc>, window_params = [{transform_indices = @transform_0, window_bounds = array<i64: 2, 8, 16>}, {transform_indices = @transform_1, window_bounds = array<i64: 2, 16, 16>}, {pipeline_mode = #tpu.pipeline_mode<synchronous>, transform_indices = @transform_2, window_bounds = array<i64: 1, 16>}, {transform_indices = @transform_3, window_bounds = array<i64: 2, 8, 16>}]} {
    %c0 = arith.constant 0 : index
    %c0_0 = arith.constant 0 : index
    %c0_1 = arith.constant 0 : index
    %0 = vector.load %arg2[%c0, %c0_0, %c0_1] : memref<2x8x16xbf16, #tpu.memory_space<vmem>>, vector<2x8x16xbf16>
    %c0_2 = arith.constant 0 : index
    %c0_3 = arith.constant 0 : index
    %c0_4 = arith.constant 0 : index
    %1 = vector.load %arg3[%c0_2, %c0_3, %c0_4] : memref<2x16x16xbf16, #tpu.memory_space<vmem>>, vector<2x16x16xbf16>
    "tpu.trace_start"() <{level = 10 : i32, message = "bik,bko->bio"}> : () -> ()
    %cst = arith.constant dense<0.000000e+00> : vector<2x8x16xf32>
    %2 = tpu.matmul %0, %1, %cst {dimension_numbers = #tpu.dot_dimension_numbers<[2], [1], [1], [2], [0, 0, 0, 1, 1, 2], [0], [0]>} : vector<2x8x16xbf16>, vector<2x16x16xbf16>, vector<2x8x16xf32> -> vector<2x8x16xf32>
    "tpu.trace_stop"() : () -> ()
    %c0_5 = arith.constant 0 : index
    %c0_6 = arith.constant 0 : index
    %3 = vector.load %arg4[%c0_5, %c0_6] : memref<1x16xf32, #tpu.memory_space<vmem>>, vector<1x16xf32>
    %4 = vector.shape_cast %3 : vector<1x16xf32> to vector<1x1x16xf32>
    %5 = vector.broadcast %4 : vector<1x1x16xf32> to vector<2x8x16xf32>
    %6 = arith.addf %2, %5 : vector<2x8x16xf32>
    %c0_7 = arith.constant 0 : index
    %c0_8 = arith.constant 0 : index
    %c0_9 = arith.constant 0 : index
    %7 = vector.load %arg5[%c0_7, %c0_8, %c0_9] : memref<2x8x16xf32, #tpu.memory_space<vmem>>, vector<2x8x16xf32>
    tpu.vector_store %arg5[%c0_7, %c0_8, %c0_9], %6 {strides = array<i32>} : memref<2x8x16xf32, #tpu.memory_space<vmem>>, vector<2x8x16xf32>,
    return
  }
  func.func @transform_0(%arg0: i32, %arg1: i32) -> (i32, i32, i32) {
    %c0_i32 = arith.constant 0 : i32
    %c0_i32_0 = arith.constant 0 : i32
    return %arg0, %arg1, %c0_i32 : i32, i32, i32
  }
  func.func @transform_1(%arg0: i32, %arg1: i32) -> (i32, i32, i32) {
    %c0_i32 = arith.constant 0 : i32
    %c0_i32_0 = arith.constant 0 : i32
    %c0_i32_1 = arith.constant 0 : i32
    return %arg0, %c0_i32, %c0_i32_0 : i32, i32, i32
  }
  func.func @transform_2(%arg0: i32, %arg1: i32) -> (i32, i32) {
    %c0_i32 = arith.constant 0 : i32
    %c0_i32_0 = arith.constant 0 : i32
    %c0_i32_1 = arith.constant 0 : i32
    return %c0_i32, %c0_i32_0 : i32, i32
  }
  func.func @transform_3(%arg0: i32, %arg1: i32) -> (i32, i32, i32) {
    %c0_i32 = arith.constant 0 : i32
    %c0_i32_0 = arith.constant 0 : i32
    return %arg0, %arg1, %c0_i32 : i32, i32, i32
  }
}

</mosaic_0001>

<bundles_post_ra>
// kernel: tpu_custom_call.1
= control target key start
LH: loop header
LB: loop body
LE: loop exit
PB: predicated region body
PF: predicated region fallthrough
CT: control target
= control target key end

     0   :  { %8 = vsyncpa [#allocation3], 0  ;;  %s352_s0 = inlined_call_operand.hbm [shape: bf16[2,8,16], index: 0, kind: input, shape index: {}]   ;;  %s353_s1 = inlined_call_operand.hbm [shape: bf16[2,16,16], index: 1, kind: input, shape index: {}]   ;;  %s354_s2 = inlined_call_operand.vmem [shape: f32[1,16], index: 2, kind: input, shape index: {}]   ;;  %s355_s3 = inlined_call_operand.hbm [shape: f32[2,8,16], index: 3, kind: output, shape index: {}]  }
   0x1   :  { %9 = vsyncpa [#allocation6], 0 }
   0x2   :  { %10 = vsyncpa [#allocation4], 0  ;;  %s280_s12 = smov [#allocation2]   ;;  %s208_s16 = scalar_lea.hbm %s352_s0, 128 }
   0x3   :  { %s16_s13 = sshll.u32 %s280_s12, 4  ;;  %p209_p0 = scmp.ne.s32.totalorder %s352_s0, %s208_s16  ;;  %s17_s13 = int_to_ptr.vmem [resolvable:$true] %s16_s13 }
   0x4   :  { %p212_p1 = scmp.lt.u32.totalorder %s208_s16, %s352_s0 }
   0x6   :  { %p214_p2 = pnand %p212_p1, %p209_p0 }
   0x8   :  { %217 = shalt.err (!%p214_p2)
}
   0x9   :  { %s218_s21 = scalar_lea.vmem %s17_s13, 128  ;;  %p223_p4 = scmp.lt.s32.totalorder %s17_s13, %s17_s13 }
   0xa   :  { %p219_p3 = scmp.ne.s32.totalorder %s17_s13, %s218_s21  ;;  %p224_p5 = scmp.lt.s32.totalorder %s218_s21, %s218_s21 }
   0xc   :  { %p225_p6 = por %p224_p5, %p223_p4 }
   0xe   :  { %p226_p7 = pnand %p225_p6, %p219_p3 }
  0x10   :  { %229 = shalt.err (!%p226_p7)
}
  0x11   :  { %s281_s22 = smov 64   ;;  %s282_s23 = smov 4  }
  0x12   :  { %22 = dma.hbm_to_vmem [thread:$0]  %s352_s0, 128, %s17_s13, [#allocation3], %s281_s22, %s281_s22, %s282_s23  }
  0x13   :  { %s283_s26 = smov [#allocation5]   ;;  %s230_s30 = scalar_lea.hbm %s353_s1, 256 }
  0x14   :  { %s28_s27 = sshll.u32 %s283_s26, 4  ;;  %p231_p8 = scmp.ne.s32.totalorder %s353_s1, %s230_s30  ;;  %s29_s27 = int_to_ptr.vmem [resolvable:$true] %s28_s27 }
  0x15   :  { %p234_p9 = scmp.lt.u32.totalorder %s230_s30, %s353_s1 }
  0x17   :  { %p236_p10 = pnand %p234_p9, %p231_p8 }
  0x19   :  { %239 = shalt.err (!%p236_p10)
}
  0x1a   :  { %s240_s8 = scalar_lea.vmem %s29_s27, 256  ;;  %p245_p12 = scmp.lt.s32.totalorder %s29_s27, %s29_s27 }
  0x1b   :  { %p241_p11 = scmp.ne.s32.totalorder %s29_s27, %s240_s8  ;;  %p246_p13 = scmp.lt.s32.totalorder %s240_s8, %s240_s8 }
  0x1d   :  { %p247_p0 = por %p246_p13, %p245_p12 }
  0x1f   :  { %p248_p1 = pnand %p247_p0, %p241_p11 }
  0x21   :  { %251 = shalt.err (!%p248_p1)
}
  0x22   :  { %34 = dma.hbm_to_vmem [thread:$0]  %s353_s1, 256, %s29_s27, [#allocation6], %s281_s22, %s281_s22, %s282_s23  }
  0x23   :  { %274 = dma.done.wait [#allocation3], 128  }
  0x24   :  { %275 = vsyncadd [#allocation3], 4294967168 }
  0x25   :  { %276 = dma.done.wait [#allocation6], 256  }
  0x26   :  { %277 = vsyncadd [#allocation6], 4294967040  ;;  %v284_v0 = vmov 0.0   ;;  %vm285_vm0 = vmmov 0   ;;  %v206_v1 = vld [vmem:[#allocation5] sm:$0xff]   ;;  %v207_v2 = vld [vmem:[#allocation5 + $0x8] sm:$0xff]  }
  0x27   :  { %185 = vmatprep.subr.bf16.mxu0 %v284_v0  ;;  %191 = vmatprep.subr.bf16.mxu1 %v284_v0  ;;  %v44_v3 = vld [vmem:[#allocation2] sm:$0xf]  ;;  %vm63_vm1 = vcmask 130048   ;;  %v45_v4 = vld [vmem:[#allocation2 + $0x4] sm:$0xf]  ;;  %s286_s11 = smov [#allocation7]  }
  0x28   :  { %187 = vmatprep.mubr.msk.bf16.mxu0 %vm285_vm0, %v284_v0  ;;  %193 = vmatprep.mubr.msk.bf16.mxu1 %vm285_vm0, %v284_v0  ;;  %v176_v5 = vld [vmem:[%s354_s2] ss:$0 sm:$0xff]  ;;  %s163_s12 = sshll.u32 %s286_s11, 4  ;;  %s164_s12 = int_to_ptr.vmem [resolvable:$true] %s163_s12 }
  0x29   :  { %186 = vmatpush3.bf16.msra.mxu0 %v206_v1  ;;  %192 = vmatpush3.bf16.msra.mxu1 %v207_v2  ;;  %s252_s13 = scalar_lea.vmem %s164_s12, 256  ;;  %p257_p3 = scmp.lt.s32.totalorder %s164_s12, %s164_s12 }
  0x2a   :  { %p253_p2 = scmp.ne.s32.totalorder %s164_s12, %s252_s13  ;;  %p258_p4 = scmp.lt.s32.totalorder %s252_s13, %s252_s13 }
  0x2c   :  { %188 = vmatmul.mubr.msk.bf16.vlgmr.msra.gmra.mrb[0].mxu0 %vm63_vm1, %v44_v3  ;;  %194 = vmatmul.mubr.msk.bf16.vlgmr.msra.gmra.mrb[0].mxu1 %vm63_vm1, %v45_v4  ;;  %p259_p5 = por %p258_p4, %p257_p3 }
  0x2e   :  { %p260_p6 = pnand %p259_p5, %p253_p2 }
  0xff   :  { %v101_v6 = vpop.f32.mrb[0].mxu0  ;;  %v150_v8 = vpop.f32.mrb[0].mxu1 }
 0x100   :  { %v102_v7 = vadd.f32 %v176_v5, %v101_v6  ;;  %v189_v9 = vpop.f32.mrb[1].mxu0  ;;  %v151_v10 = vadd.f32 %v176_v5, %v150_v8  ;;  %v195_v11 = vpop.f32.mrb[1].mxu1 }
 0x101   :  { %v104_v12 = vpop.f32.mrb[2].mxu0  ;;  %v153_v13 = vpop.f32.mrb[2].mxu1 }
 0x102   :  { %156 = vst.msk [vmem:[#allocation7] sm:$0xff] %vm63_vm1, %v102_v7  ;;  %v190_v14 = vpop.f32.mrb[3].mxu0  ;;  %157 = vst.msk [vmem:[#allocation7 + $0x8] sm:$0xff] %vm63_vm1, %v151_v10  ;;  %v196_v15 = vpop.f32.mrb[3].mxu1 }
 0x103   :  { %263 = shalt.err (!%p260_p6)
}
 0x104   :  { %s264_s15 = scalar_lea.hbm %s355_s3, 256 }
 0x105   :  { %p265_p7 = scmp.ne.s32.totalorder %s355_s3, %s264_s15  ;;  %p268_p8 = scmp.lt.u32.totalorder %s264_s15, %s355_s3 }
 0x107   :  { %p270_p9 = pnand %p268_p8, %p265_p7 }
 0x109   :  { %273 = shalt.err (!%p270_p9)
}
 0x10a   :  { %s287_s20 = smov 128   ;;  %s288_s21 = smov 8  }
 0x10b   :  { %169 = dma.vmem_to_hbm [thread:$0]  %s164_s12, 256, %s355_s3, [#allocation4], %s287_s20, %s287_s20, %s288_s21  }
 0x10c   :  { %278 = dma.done.wait [#allocation4], 256  }
 0x10d   :  { %279 = vsyncadd [#allocation4], 4294967040 }
 0x10e   :  { %173 = vsyncpa [#allocation3], 1 }
 0x10f   :  { %174 = vsyncpa [#allocation6], 1 }
 0x110   :  { %175 = vsyncpa [#allocation4], 1 }

</bundles_post_ra>
